<compile_context>
chip_gen: v7x
topology: tpu7x:2x2x1
jax: 0.10.0
libtpu: 0.0.40
codegen_flags: <defaults>
</compile_context>

<pallas_src>
import jax
import jax.numpy as jnp
from jax.experimental import pallas as pl
from jax.experimental.pallas import tpu as pltpu


_D_CHUNK = 512  # lanes per reduction chunk (bounds any product temp / vreg live range)


def _cdiv(a, b):
    return -(-a // b)


def _vmem_capacity_bytes():
    """Physical VMEM of the attached TPU; conservative 64 MiB fallback (v7x-sized)."""
    try:
        info = pltpu.get_tpu_info()
        cap = getattr(info, "vmem_capacity_bytes", None)
        if cap:
            return int(cap)
    except Exception:
        pass
    return 64 * 1024 * 1024


def _make_logistic_kernel(tb, d):
    assert tb % 64 == 0, "tile rows must be a multiple of 64 (tbq multiple of 8)"
    tbq = tb // 8
    chunk_starts = list(range(0, d, _D_CHUNK))

    def kernel(x_ref, w_ref, b_ref, o_ref):
        # x_ref: (tb, D) f32 batch tile (last grid tile may be only partially valid)
        # w_ref: (1, D)  f32 weight row, VMEM-resident across all grid steps
        # b_ref: (1, 1)  f32 bias scalar in SMEM
        # o_ref: (1, 8, tb//8) f32 lane-dense output tile
        acc = None
        for s in chunk_starts:                       # static unroll; 1 iter when D <= 512
            e = min(s + _D_CHUNK, d)
            # Rows regroup (tb, ck) -> (1, 8, tbq, ck); tbq % 8 == 0 keeps this layout-cheap.
            xs = x_ref[:, s:e].reshape(1, 8, tbq, e - s)
            p = jnp.sum(xs * w_ref[:, s:e], axis=-1)  # VPU multiply + lane reduce -> (1, 8, tbq)
            acc = p if acc is None else acc + p
        z = acc + b_ref[0, 0]                         # scalar bias from SMEM
        o_ref[...] = jax.nn.sigmoid(z).astype(o_ref.dtype)

    return kernel


def logistic_forward(x, weight, bias, *, tile_rows=None):
    """y = sigmoid(x @ weight.T + bias).

    x: (B, D) f32, weight: (1, D) f32 (PyTorch nn.Linear layout), bias: (1,) f32.
    """
    B, D = x.shape
    dtype = jnp.float32
    x = x.astype(dtype)
    w = weight.reshape(1, D).astype(dtype)
    b = bias.reshape(1, 1).astype(dtype)

    # Tiny batches: pad up to 64 rows so tile rows stay a multiple of 64.
    # (Copies < 64 rows — negligible; the large-batch path never pads.)
    B_eff = B
    if B_eff < 64:
        x = jnp.pad(x, ((0, 64 - B_eff), (0, 0)))
        B_eff = 64

    # Per-generation VMEM budget / scoped limit.
    vmem_cap = _vmem_capacity_bytes()
    if vmem_cap >= 100 * 1024 * 1024:      # v4 / v5e / v6e class: 128 MiB VMEM
        buf_budget = 24 * 1024 * 1024
        vmem_limit = 96 * 1024 * 1024
    else:                                   # v7x class (64 MiB) or unknown: stay conservative
        buf_budget = 10 * 1024 * 1024
        vmem_limit = 48 * 1024 * 1024

    bytes_per_row = D * 4
    # Rows per tile sized by BYTES (multiple of 128 => lane-dense, unmasked output stores).
    tb = max(128, (buf_budget // bytes_per_row) // 128 * 128)
    # Never larger than the batch: round down so only the standard ragged last block occurs.
    if B_eff >= 128:
        tb = min(tb, (B_eff // 128) * 128)
    else:
        tb = min(tb, 64)
    if tile_rows is not None:
        tb = min(tb, max(64, (tile_rows // 64) * 64))

    n_tiles = _cdiv(B_eff, tb)
    if tile_rows is None:
        # Keep >= 2 grid steps (even count when cheap): both v7x TensorCores get work and the
        # double-buffered pipeline overlaps DMA with compute; an extra step costs ~0.35 us.
        for _ in range(2):
            if n_tiles >= 2 and (n_tiles % 2 == 0 or n_tiles >= 5):
                break
            if tb < 128:
                break
            tb = max(64, (tb // 2) // 64 * 64)
            n_tiles = _cdiv(B_eff, tb)

    tbq = tb // 8
    kernel = _make_logistic_kernel(tb, D)

    out = pl.pallas_call(
        kernel,
        out_shape=jax.ShapeDtypeStruct((n_tiles, 8, tbq), dtype),
        grid_spec=pltpu.PrefetchScalarGridSpec(
            num_scalar_prefetch=0,
            grid=(n_tiles,),
            in_specs=[
                pl.BlockSpec((tb, D), lambda i: (i, 0)),               # batch tile (ragged last ok)
                pl.BlockSpec((1, D), lambda i: (0, 0)),                # weights stay resident
                pl.BlockSpec(memory_space=pltpu.MemorySpace.SMEM),     # bias scalar
            ],
            out_specs=pl.BlockSpec((1, 8, tbq), lambda i: (i, 0, 0)),
        ),
        compiler_params=pltpu.CompilerParams(
            dimension_semantics=("parallel",),
            vmem_limit_bytes=vmem_limit,
        ),
    )(x, w, b)

    # Layout plumbing back to (B, 1): flatten order matches x's row order; padded /
    # out-of-range tail rows (which only ever see unspecified data) are sliced off.
    return out.reshape(n_tiles * tb, 1)[:B]


if __name__ == "__main__":
    key = jax.random.PRNGKey(0)

    # Check 1: tiny batch (pads internally to 64 rows; single tile).
    batch, input_dim = 8, 32
    kx, kw, kb = jax.random.split(key, 3)
    x = jax.random.normal(kx, (batch, input_dim), dtype=jnp.float32)
    bound = 1.0 / jnp.sqrt(jnp.float32(input_dim))
    w = jax.random.uniform(kw, (1, input_dim), minval=-bound, maxval=bound, dtype=jnp.float32)
    b = jax.random.uniform(kb, (1,), minval=-bound, maxval=bound, dtype=jnp.float32)
    y = logistic_forward(x, w, b)
    jax.block_until_ready(y)
    y_ref = jax.nn.sigmoid(x @ w.T + b)
    assert y.shape == (batch, 1)
    assert jnp.allclose(y, y_ref, atol=1e-5, rtol=1e-5)

    # Check 2: ragged batch with forced small tiles -> multi-tile grid with a partial last
    # block (the no-pad path requested by the perf review).
    B2, D2 = 300, 64
    kx2, kw2, kb2 = jax.random.split(jax.random.PRNGKey(1), 3)
    x2 = jax.random.normal(kx2, (B2, D2), dtype=jnp.float32)
    bound2 = 1.0 / jnp.sqrt(jnp.float32(D2))
    w2 = jax.random.uniform(kw2, (1, D2), minval=-bound2, maxval=bound2, dtype=jnp.float32)
    b2 = jax.random.uniform(kb2, (1,), minval=-bound2, maxval=bound2, dtype=jnp.float32)
    y2 = logistic_forward(x2, w2, b2, tile_rows=128)
    jax.block_until_ready(y2)
    y2_ref = jax.nn.sigmoid(x2 @ w2.T + b2)
    assert y2.shape == (B2, 1)
    assert jnp.allclose(y2, y2_ref, atol=1e-5, rtol=1e-5)

    # Check 3: same ragged batch with the default byte-sized tiling (2 tiles, last partial).
    y3 = logistic_forward(x2, w2, b2)
    jax.block_until_ready(y3)
    assert jnp.allclose(y3, y2_ref, atol=1e-5, rtol=1e-5)

    print("KERNEL_OK")
</pallas_src>

<mosaic_0001>
module attributes {stable_mosaic.version = 11 : i64} {
  func.func @kernel(%arg0: i32, %arg1: memref<64x32xf32, #tpu.memory_space<vmem>>, %arg2: memref<1x32xf32, #tpu.memory_space<vmem>>, %arg3: memref<1x1xf32, #tpu.memory_space<smem>>, %arg4: memref<1x8x8xf32, #tpu.memory_space<vmem>>) attributes {dimension_semantics = [#tpu.dimension_semantics<parallel>], iteration_bounds = array<i64: 1>, scalar_prefetch = 0 : i64, scratch_operands = 0 : i64, tpu.core_type = #tpu.core_type<tc>, window_params = [{transform_indices = @transform_0, window_bounds = array<i64: 64, 32>}, {pipeline_mode = #tpu.pipeline_mode<synchronous>, transform_indices = @transform_1, window_bounds = array<i64: 1, 32>}, {transform_indices = @transform_2, window_bounds = array<i64: 1, 1>}, {transform_indices = @transform_3, window_bounds = array<i64: 1, 8, 8>}]} {
    %c0 = arith.constant 0 : index
    %c0_0 = arith.constant 0 : index
    %0 = vector.load %arg1[%c0, %c0_0] : memref<64x32xf32, #tpu.memory_space<vmem>>, vector<64x32xf32>
    %1 = vector.shape_cast %0 : vector<64x32xf32> to vector<1x8x8x32xf32>
    %c0_1 = arith.constant 0 : index
    %c0_2 = arith.constant 0 : index
    %2 = vector.load %arg2[%c0_1, %c0_2] : memref<1x32xf32, #tpu.memory_space<vmem>>, vector<1x32xf32>
    %3 = vector.shape_cast %2 : vector<1x32xf32> to vector<1x1x1x32xf32>
    %4 = vector.broadcast %3 : vector<1x1x1x32xf32> to vector<1x8x8x32xf32>
    %5 = arith.mulf %1, %4 : vector<1x8x8x32xf32>
    %cst = arith.constant dense<0.000000e+00> : vector<1x8x8xf32>
    %6 = vector.multi_reduction <add>, %5, %cst [3] : vector<1x8x8x32xf32> to vector<1x8x8xf32>
    %c0_3 = arith.constant 0 : index
    %c0_4 = arith.constant 0 : index
    %7 = memref.load %arg3[%c0_3, %c0_4] : memref<1x1xf32, #tpu.memory_space<smem>>
    %8 = vector.broadcast %7 : f32 to vector<1x8x8xf32>
    %9 = arith.addf %6, %8 : vector<1x8x8xf32>
    %10 = arith.negf %9 : vector<1x8x8xf32>
    %11 = math.exp %10 : vector<1x8x8xf32>
    %cst_5 = arith.constant 1.000000e+00 : f32
    %12 = vector.broadcast %cst_5 : f32 to vector<1x8x8xf32>
    %13 = arith.addf %12, %11 : vector<1x8x8xf32>
    %14 = arith.divf %12, %13 : vector<1x8x8xf32>
    %c0_6 = arith.constant 0 : index
    %c0_7 = arith.constant 0 : index
    %c0_8 = arith.constant 0 : index
    %15 = vector.load %arg4[%c0_6, %c0_7, %c0_8] : memref<1x8x8xf32, #tpu.memory_space<vmem>>, vector<1x8x8xf32>
    tpu.vector_store %arg4[%c0_6, %c0_7, %c0_8], %14 {strides = array<i32>} : memref<1x8x8xf32, #tpu.memory_space<vmem>>, vector<1x8x8xf32>,
    return
  }
  func.func @transform_0(%arg0: i32) -> (i32, i32) {
    %c0_i32 = arith.constant 0 : i32
    %c0_i32_0 = arith.constant 0 : i32
    return %arg0, %c0_i32 : i32, i32
  }
  func.func @transform_1(%arg0: i32) -> (i32, i32) {
    %c0_i32 = arith.constant 0 : i32
    %c0_i32_0 = arith.constant 0 : i32
    %c0_i32_1 = arith.constant 0 : i32
    return %c0_i32, %c0_i32_0 : i32, i32
  }
  func.func @transform_2(%arg0: i32) -> (i32, i32) {
    %c0_i32 = arith.constant 0 : i32
    %c0_i32_0 = arith.constant 0 : i32
    %c0_i32_1 = arith.constant 0 : i32
    return %c0_i32, %c0_i32_0 : i32, i32
  }
  func.func @transform_3(%arg0: i32) -> (i32, i32, i32) {
    %c0_i32 = arith.constant 0 : i32
    %c0_i32_0 = arith.constant 0 : i32
    %c0_i32_1 = arith.constant 0 : i32
    return %arg0, %c0_i32, %c0_i32_0 : i32, i32, i32
  }
}

</mosaic_0001>

<bundles_post_ra>
// kernel: tpu_custom_call.1
= control target key start
LH: loop header
LB: loop body
LE: loop exit
PB: predicated region body
PF: predicated region fallthrough
CT: control target
= control target key end

     0   :  { %vm39_vm0 = vcmask 261120   ;;  %s332_s0 = inlined_call_operand.vmem [shape: f32[64,32], index: 0, kind: input, shape index: {}]   ;;  %s333_s1 = inlined_call_operand.vmem [shape: f32[1,32], index: 1, kind: input, shape index: {}]   ;;  %s334_s2 = inlined_call_operand.<no memory space> [shape: f32[1,1], index: 2, kind: input, shape index: {}]   ;;  %s335_s3 = inlined_call_operand.hbm [shape: f32[1,8,8], index: 3, kind: output, shape index: {}]  }
   0x1   :  { %v16_v0 = vld [vmem:[%s332_s0] sm:$0xff]  ;;  %v18_v2 = vld [vmem:[%s332_s0 + $0x10] sm:$0xff]  ;;  %v17_v5 = vld [vmem:[%s332_s0 + $0x8] sm:$0xff] }
   0x2   :  { %v195_v1 = vld [vmem:[%s333_s1] ss:$0 sm:$0xff]  ;;  %v19_v6 = vld [vmem:[%s332_s0 + $0x18] sm:$0xff]  ;;  %v21_v10 = vld [vmem:[%s332_s0 + $0x28] sm:$0xff] }
   0x3   :  { %v31_v3 = vmul.f32 %v195_v1, %v16_v0  ;;  %v33_v4 = vmul.f32 %v195_v1, %v18_v2  ;;  %v32_v7 = vmul.f32 %v195_v1, %v17_v5  ;;  %v34_v8 = vmul.f32 %v195_v1, %v19_v6  ;;  %v20_v9 = vld [vmem:[%s332_s0 + $0x20] sm:$0xff] }
   0x5   :  { %v40_v11 = vsel %vm39_vm0, %v31_v3, 0.0  ;;  %v46_v12 = vsel %vm39_vm0, %v33_v4, 0.0 }
   0x6   :  { %9 = vsyncpa [#allocation4], 0  ;;  %41 = vadd.xlane.f32.xlu0 %v40_v11  ;;  %47 = vadd.xlane.f32.xlu1 %v46_v12  ;;  %v43_v13 = vsel %vm39_vm0, %v32_v7, 0.0  ;;  %v49_v14 = vsel %vm39_vm0, %v34_v8, 0.0  ;;  %v35_v15 = vmul.f32 %v195_v1, %v20_v9  ;;  %v36_v16 = vmul.f32 %v195_v1, %v21_v10  ;;  %v22_v17 = vld [vmem:[%s332_s0 + $0x30] sm:$0xff]  ;;  %v23_v18 = vld [vmem:[%s332_s0 + $0x38] sm:$0xff] }
   0x7   :  { %v37_v21 = vmul.f32 %v195_v1, %v22_v17  ;;  %v38_v22 = vmul.f32 %v195_v1, %v23_v18  ;;  %v65_v25 = vstv %s334_s2  ;;  %v130_v57 = vlaneseq  ;;  %s261_s0 = smov [#allocation3]  }
   0x8   :  { %v52_v19 = vsel %vm39_vm0, %v35_v15, 0.0  ;;  %v55_v20 = vsel %vm39_vm0, %v36_v16, 0.0  ;;  %vm164_vm1 = vcmask 1041409   ;;  %vm166_vm2 = vcmask 1042434   ;;  %s187_s2 = sshll.u32 %s261_s0, 4  ;;  %s188_s2 = int_to_ptr.vmem [resolvable:$true] %s187_s2 }
   0x9   :  { %v58_v23 = vsel %vm39_vm0, %v37_v21, 0.0  ;;  %v61_v24 = vsel %vm39_vm0, %v38_v22, 0.0  ;;  %v131_v62 = vand.u32 127, %v130_v57  ;;  %v133_v63 = vshrl.u32 %v130_v57, 7  ;;  %s237_s4 = scalar_lea.vmem %s188_s2, 128  ;;  %p242_p1 = scmp.lt.s32.totalorder %s188_s2, %s188_s2 }
   0xa   :  { %44 = vadd.xlane.f32.xlu0 %v43_v13  ;;  %50 = vadd.xlane.f32.xlu1 %v49_v14  ;;  %vm168_vm3 = vcmask 1043459   ;;  %vm170_vm4 = vcmask 1044484   ;;  %vm172_vm5 = vcmask 1045509   ;;  %vm174_vm6 = vcmask 1046534   ;;  %p238_p0 = scmp.ne.s32.totalorder %s188_s2, %s237_s4  ;;  %p243_p2 = scmp.lt.s32.totalorder %s237_s4, %s237_s4 }
   0xb   :  { %v134_v4 = vsub.s32 %v131_v62, %v133_v63  ;;  %vm176_vm7 = vcmask 1047559   ;;  %vm179_vm8 = vcmask 64512  }
   0xc   :  { %p244_p3 = por %p243_p2, %p242_p1 }
   0xe   :  { %53 = vadd.xlane.f32.xlu0 %v52_v19  ;;  %56 = vadd.xlane.f32.xlu1 %v55_v20  ;;  %p245_p4 = pnand %p244_p3, %p238_p0 }
  0x12   :  { %59 = vadd.xlane.f32.xlu0 %v58_v23  ;;  %62 = vadd.xlane.f32.xlu1 %v61_v24 }
  0x93   :  { %v42_v26 = vpop.xlane.xlu0 %41  ;;  %v48_v27 = vpop.xlane.xlu1 %47 }
  0x94   :  { %v66_v28 = vadd.f32 %v65_v25, %v42_v26  ;;  %v68_v29 = vadd.f32 %v65_v25, %v48_v27 }
  0x96   :  { %v196_v30 = vmul.f32 -1.442695, %v66_v28  ;;  %v198_v31 = vmul.f32 -1.442695, %v68_v29 }
  0x97   :  { %v45_v32 = vpop.xlane.xlu0 %44  ;;  %v51_v33 = vpop.xlane.xlu1 %50 }
  0x98   :  { %205 = vpow2.f32 %v196_v30  ;;  %v67_v34 = vadd.f32 %v65_v25, %v45_v32  ;;  %v69_v35 = vadd.f32 %v65_v25, %v51_v33 }
  0x99   :  { %207 = vpow2.f32 %v198_v31 }
  0x9a   :  { %v197_v36 = vmul.f32 -1.442695, %v67_v34  ;;  %v199_v37 = vmul.f32 -1.442695, %v69_v35 }
  0x9b   :  { %v54_v38 = vpop.xlane.xlu0 %53  ;;  %v57_v39 = vpop.xlane.xlu1 %56 }
  0x9c   :  { %209 = vpow2.f32 %v197_v36  ;;  %v70_v40 = vadd.f32 %v65_v25, %v54_v38  ;;  %v71_v41 = vadd.f32 %v65_v25, %v57_v39 }
  0x9d   :  { %211 = vpow2.f32 %v199_v37 }
  0x9e   :  { %v200_v42 = vmul.f32 -1.442695, %v70_v40  ;;  %v201_v43 = vmul.f32 -1.442695, %v71_v41 }
  0x9f   :  { %v60_v44 = vpop.xlane.xlu0 %59  ;;  %v63_v45 = vpop.xlane.xlu1 %62 }
  0xa0   :  { %213 = vpow2.f32 %v200_v42  ;;  %v72_v46 = vadd.f32 %v65_v25, %v60_v44  ;;  %v73_v47 = vadd.f32 %v65_v25, %v63_v45 }
  0xa1   :  { %215 = vpow2.f32 %v201_v43 }
  0xa2   :  { %v206_v48 = vpop.eup %205  ;;  %v202_v49 = vmul.f32 -1.442695, %v72_v46  ;;  %v203_v52 = vmul.f32 -1.442695, %v73_v47 }
  0xa3   :  { %v208_v50 = vpop.eup %207  ;;  %v98_v51 = vadd.f32 1.0, %v206_v48 }
  0xa4   :  { %v100_v53 = vadd.f32 1.0, %v208_v50  ;;  %217 = vpow2.f32 %v202_v49 }
  0xa5   :  { %219 = vrcp.f32 %v98_v51 }
  0xa6   :  { %v210_v54 = vpop.eup %209  ;;  %221 = vpow2.f32 %v203_v52 }
  0xa7   :  { %v212_v55 = vpop.eup %211  ;;  %v99_v56 = vadd.f32 1.0, %v210_v54  ;;  %223 = vrcp.f32 %v100_v53 }
  0xa8   :  { %v101_v58 = vadd.f32 1.0, %v212_v55 }
  0xa9   :  { %225 = vrcp.f32 %v99_v56 }
  0xaa   :  { %v214_v59 = vpop.eup %213  ;;  %227 = vrcp.f32 %v101_v58 }
  0xab   :  { %v216_v60 = vpop.eup %215  ;;  %v102_v61 = vadd.f32 1.0, %v214_v59 }
  0xac   :  { %v103_v0 = vadd.f32 1.0, %v216_v60 }
  0xad   :  { %229 = vrcp.f32 %v102_v61 }
  0xae   :  { %v218_v1 = vpop.eup %217  ;;  %231 = vrcp.f32 %v103_v0 }
  0xaf   :  { %v104_v2 = vadd.f32 1.0, %v218_v1  ;;  %v220_v3 = vpop.eup %219 }
  0xb0   :  { %v222_v5 = vpop.eup %221  ;;  %v135_v10 = vrot.slane %v220_v3, %v134_v4 }
  0xb1   :  { %233 = vrcp.f32 %v104_v2  ;;  %v224_v6 = vpop.eup %223  ;;  %v105_v7 = vadd.f32 1.0, %v222_v5 }
  0xb2   :  { %v143_v12 = vrot.slane %v224_v6, %v134_v4 }
  0xb3   :  { %v226_v8 = vpop.eup %225  ;;  %235 = vrcp.f32 %v105_v7 }
  0xb4   :  { %v228_v9 = vpop.eup %227  ;;  %v139_v11 = vrot.slane %v226_v8, %v134_v4 }
  0xb5   :  { %v147_v13 = vrot.slane %v228_v9, %v134_v4 }
  0xb6   :  { %v165_v14 = vsel %vm164_vm1, %v139_v11, %v135_v10 }
  0xb7   :  { %v230_v15 = vpop.eup %229  ;;  %v167_v16 = vsel %vm166_vm2, %v143_v12, %v165_v14 }
  0xb8   :  { %v232_v17 = vpop.eup %231  ;;  %v151_v18 = vrot.slane %v230_v15, %v134_v4  ;;  %v169_v19 = vsel %vm168_vm3, %v147_v13, %v167_v16 }
  0xb9   :  { %v155_v20 = vrot.slane %v232_v17, %v134_v4 }
  0xba   :  { %v171_v21 = vsel %vm170_vm4, %v151_v18, %v169_v19 }
  0xbb   :  { %v234_v22 = vpop.eup %233  ;;  %v173_v24 = vsel %vm172_vm5, %v155_v20, %v171_v21 }
  0xbc   :  { %v159_v23 = vrot.slane %v234_v22, %v134_v4 }
  0xbd   :  { %v236_v25 = vpop.eup %235 }
  0xbe   :  { %v175_v26 = vsel %vm174_vm6, %v159_v23, %v173_v24  ;;  %v163_v27 = vrot.slane %v236_v25, %v134_v4 }
  0xc0   :  { %v177_v28 = vsel %vm176_vm7, %v163_v27, %v175_v26 }
  0xc1   :  { %180 = vst.msk [vmem:[#allocation3] sm:$0xff] %vm179_vm8, %v177_v28 }
  0xc2   :  { %248 = shalt.err (!%p245_p4)
}
  0xc3   :  { %s249_s7 = scalar_lea.hbm %s335_s3, 128 }
  0xc4   :  { %p250_p5 = scmp.ne.s32.totalorder %s335_s3, %s249_s7  ;;  %p253_p6 = scmp.lt.u32.totalorder %s249_s7, %s335_s3 }
  0xc6   :  { %p255_p7 = pnand %p253_p6, %p250_p5 }
  0xc8   :  { %258 = shalt.err (!%p255_p7)
}
  0xc9   :  { %190 = dma.vmem_to_hbm [thread:$0]  %s188_s2, 128, %s335_s3, [#allocation4]  }
  0xca   :  { %259 = dma.done.wait [#allocation4], 128  }
  0xcb   :  { %260 = vsyncadd [#allocation4], 4294967168 }
  0xcc   :  { %194 = vsyncpa [#allocation4], 1 }

</bundles_post_ra>
